<compile_context>
chip_gen: v7x
topology: tpu7x:2x2x1
jax: 0.10.0
libtpu: 0.0.40
codegen_flags: <defaults>
</compile_context>

<pallas_src>
from functools import partial

import jax
import jax.numpy as jnp
from jax.experimental import pallas as pl
from jax.experimental.pallas import tpu as pltpu


_MXU_NCHAN_THRESHOLD = 8          # use one-hot MXU gather at/above this channel count
_MIN_PALLAS_BYTES = 512 * 1024    # below this, plain XLA gather is at least as fast
_VMEM_LIMIT_BYTES = 32 * 1024 * 1024


def _channels_dropout_kernel(idx_ref, x_ref, o_ref):
    # idx_ref: VMEM (Bt, C, 1) int32 -- effective source channel per (b, c); C on sublanes
    # x_ref  : VMEM (Bt, C, H)       -- input tile (H multiple of 128 -> lane-dense)
    # o_ref  : VMEM (Bt, C, H)       -- output tile
    x = x_ref[...]                            # one dense full-tile load
    idx = idx_ref[...]                        # (Bt, C, 1) int32
    nchan = x_ref.shape[1]

    if nchan >= _MXU_NCHAN_THRESHOLD:
        # One-hot gather on the MXU: out[b] = onehot(idx[b]) @ x[b].
        # Single pass, uses an otherwise-idle unit; keeps VPU / vst slots free.
        src = jax.lax.broadcasted_iota(jnp.int32, (1, 1, nchan), 2)     # (1, 1, S)
        onehot = (idx == src).astype(x.dtype)                           # (Bt, C, S)
        gathered = jnp.einsum("bcs,bsh->bch", onehot, x,
                              preferred_element_type=jnp.float32)
        o_ref[...] = gathered.astype(o_ref.dtype)
    else:
        # Small static channel count: unrolled chain of dtype-preserving VPU selects.
        out = x
        for s in range(nchan):
            sel = idx == s                    # (Bt, C, 1) bool, broadcast over lanes
            row = x[:, s:s + 1, :]            # (Bt, 1, H) source channel row
            out = jnp.where(sel, row, out)
        o_ref[...] = out                      # one dense, lane-aligned full-tile store


def _pick_batch_tile(batch, nchan, hdim_padded, itemsize,
                     vmem_budget_bytes=20 * 1024 * 1024,
                     min_grid_blocks=8):
    """Largest batch tile whose *padded, double-buffered* VMEM footprint fits the
    budget, capped so the grid keeps >= min_grid_blocks steps (v7x has 2 TCs)."""
    # Sublane tiling of the second-to-last dim depends on element width.
    sublane = {4: 8, 2: 16, 1: 32}.get(itemsize, 8)
    nchan_pad = pl.cdiv(nchan, sublane) * sublane
    # Per-batch-row padded VMEM bytes for one x/out block ...
    row_x = nchan_pad * hdim_padded * itemsize
    # ... and for the idx block: int32, minor dims (C, 1) pad to (8k, 128).
    row_idx = pl.cdiv(nchan, 8) * 8 * 128 * 4
    # Double-buffered x + double-buffered out + double-buffered idx.
    per_row = 2 * row_x + 2 * row_x + 2 * row_idx
    bt = max(1, vmem_budget_bytes // per_row)
    # Keep at least `min_grid_blocks` grid steps so both v7x cores stay busy.
    bt = min(bt, max(1, pl.cdiv(batch, min_grid_blocks)))
    return min(bt, batch)


def _sample_effective_indices(key, channel_acc, batch, nchan, dropout_prob):
    """Plain-JAX glue: per-(b, c) effective source channel (mask folded in)."""
    acc = jnp.asarray(channel_acc, dtype=jnp.float32)
    proba = jnp.maximum(1.0 - acc, 0.0)            # clamp negative "probabilities"
    total = proba.sum()
    safe_total = jnp.where(total > 0.0, total, 1.0)
    proba = jnp.where(total > 0.0, proba / safe_total,
                      jnp.full_like(proba, 1.0 / nchan))   # all-acc==1 -> uniform
    k_mask, k_idx = jax.random.split(key)
    mask = jax.random.uniform(k_mask, (batch,)) < dropout_prob
    # torch.multinomial(proba, nchan, replacement=True) == iid categorical draws.
    idx = jax.random.categorical(k_idx, jnp.log(proba),
                                 shape=(batch, nchan)).astype(jnp.int32)
    idx = jnp.clip(idx, 0, nchan - 1)              # defensive: no VMEM bounds checks
    identity = jnp.arange(nchan, dtype=jnp.int32)[None, :]
    return jnp.where(mask[:, None], idx, identity)


@partial(jax.jit, static_argnames=("donate_x",))
def _gather_channels_pallas(x, idx_eff, donate_x=False):
    batch, nchan, hdim = x.shape
    itemsize = x.dtype.itemsize

    # Guarantee a lane-dense last dim: pad hdim to a multiple of 128, slice after.
    hdim_p = pl.cdiv(hdim, 128) * 128
    padded = hdim_p != hdim
    x_p = jnp.pad(x, ((0, 0), (0, 0), (0, hdim_p - hdim))) if padded else x

    bt = _pick_batch_tile(batch, nchan, hdim_p, itemsize)
    grid = (pl.cdiv(batch, bt),)

    # Channel axis on sublanes: trailing singleton so idx compares line up with x.
    idx3 = idx_eff[:, :, None]                     # (B, C, 1) int32

    bytes_accessed = 2 * batch * nchan * hdim_p * itemsize + batch * nchan * 4
    # Alias the padded copy (fresh buffer) into the output; for unpadded x only when
    # the caller explicitly donates it.
    io_aliases = {1: 0} if (padded or donate_x) else {}

    out = pl.pallas_call(
        _channels_dropout_kernel,
        out_shape=jax.ShapeDtypeStruct((batch, nchan, hdim_p), x.dtype),
        grid_spec=pl.GridSpec(
            grid=grid,
            in_specs=[
                pl.BlockSpec((bt, nchan, 1), lambda i: (i, 0, 0)),
                pl.BlockSpec((bt, nchan, hdim_p), lambda i: (i, 0, 0)),
            ],
            out_specs=pl.BlockSpec((bt, nchan, hdim_p), lambda i: (i, 0, 0)),
        ),
        compiler_params=pltpu.CompilerParams(
            dimension_semantics=("parallel",),
            vmem_limit_bytes=_VMEM_LIMIT_BYTES,
        ),
        cost_estimate=pl.CostEstimate(
            flops=0, transcendentals=0, bytes_accessed=bytes_accessed),
        input_output_aliases=io_aliases,
    )(idx3, x_p)

    if padded:
        out = out[:, :, :hdim]
    return out


def channels_dropout(x, channel_acc, key, dropout_prob=1.0, training=True,
                     use_pallas=None, donate_x=False):
    """Pallas-backed equivalent of ChannelsDropout.forward."""
    if (not training) or dropout_prob == 0.0:
        return x
    batch, nchan, hdim = x.shape
    idx_eff = _sample_effective_indices(key, channel_acc, batch, nchan, dropout_prob)

    if use_pallas is None:
        use_pallas = x.size * x.dtype.itemsize >= _MIN_PALLAS_BYTES
    if not use_pallas:
        # Tiny tensors: fixed pallas_call overhead dominates; plain XLA gather wins.
        return jnp.take_along_axis(x, idx_eff[:, :, None], axis=1)
    return _gather_channels_pallas(x, idx_eff, donate_x=donate_x)


if __name__ == "__main__":
    key = jax.random.PRNGKey(0)
    k1, k2, k3, k4 = jax.random.split(key, 4)

    # Case 1: small nchan (VPU select-chain path), hdim NOT a multiple of 128 (pad path).
    batch, nchan, hdim = 16, 4, 96
    x = jax.random.normal(k1, (batch, nchan, hdim), dtype=jnp.float32)
    channel_acc = [0.9, 0.5, 0.7, 0.2]
    dropout_prob = 0.75
    out = channels_dropout(x, channel_acc, k2, dropout_prob=dropout_prob,
                           training=True, use_pallas=True)
    out = jax.block_until_ready(out)
    assert out.shape == x.shape and out.dtype == x.dtype
    idx_eff = _sample_effective_indices(k2, channel_acc, batch, nchan, dropout_prob)
    ref = jnp.take_along_axis(x, idx_eff[:, :, None], axis=1)
    assert jnp.allclose(out, ref), "select-chain path does not match JAX reference"

    # Case 2: nchan >= 8 exercises the one-hot MXU gather path.
    batch2, nchan2, hdim2 = 8, 8, 128
    x2 = jax.random.normal(k3, (batch2, nchan2, hdim2), dtype=jnp.float32)
    acc2 = [0.1 * i for i in range(nchan2)]
    out2 = channels_dropout(x2, acc2, k4, dropout_prob=0.5,
                            training=True, use_pallas=True)
    out2 = jax.block_until_ready(out2)
    assert out2.shape == x2.shape and out2.dtype == x2.dtype
    idx2 = _sample_effective_indices(k4, acc2, batch2, nchan2, 0.5)
    ref2 = jnp.take_along_axis(x2, idx2[:, :, None], axis=1)
    assert jnp.allclose(out2, ref2), "one-hot MXU path does not match JAX reference"

    print("KERNEL_OK")
</pallas_src>

<mosaic_0001>
module attributes {stable_mosaic.version = 11 : i64} {
  func.func @_channels_dropout_kernel(%arg0: i32, %arg1: memref<2x4x1xi32, #tpu.memory_space<vmem>>, %arg2: memref<2x4x128xf32, #tpu.memory_space<vmem>>, %arg3: memref<2x4x128xf32, #tpu.memory_space<vmem>>) attributes {dimension_semantics = [#tpu.dimension_semantics<parallel>], iteration_bounds = array<i64: 8>, scalar_prefetch = 0 : i64, scratch_operands = 0 : i64, tpu.core_type = #tpu.core_type<tc>, window_params = [{transform_indices = @transform_0, window_bounds = array<i64: 2, 4, 1>}, {transform_indices = @transform_1, window_bounds = array<i64: 2, 4, 128>}, {transform_indices = @transform_2, window_bounds = array<i64: 2, 4, 128>}]} {
    %c0 = arith.constant 0 : index
    %c0_0 = arith.constant 0 : index
    %c0_1 = arith.constant 0 : index
    %0 = vector.load %arg2[%c0, %c0_0, %c0_1] : memref<2x4x128xf32, #tpu.memory_space<vmem>>, vector<2x4x128xf32>
    %c0_2 = arith.constant 0 : index
    %c0_3 = arith.constant 0 : index
    %c0_4 = arith.constant 0 : index
    %1 = vector.load %arg1[%c0_2, %c0_3, %c0_4] : memref<2x4x1xi32, #tpu.memory_space<vmem>>, vector<2x4x1xi32>
    %c0_i32 = arith.constant 0 : i32
    %2 = vector.broadcast %c0_i32 : i32 to vector<2x4x1xi32>
    %3 = arith.cmpi eq, %1, %2 : vector<2x4x1xi32>
    %4 = vector.extract_strided_slice %0 {offsets = [0, 0, 0], sizes = [2, 1, 128], strides = [1, 1, 1]} : vector<2x4x128xf32> to vector<2x1x128xf32>
    %5 = vector.shape_cast %3 : vector<2x4x1xi1> to vector<2x4x1xi1>
    %6 = vector.broadcast %5 : vector<2x4x1xi1> to vector<2x4x128xi1>
    %7 = vector.shape_cast %4 : vector<2x1x128xf32> to vector<2x1x128xf32>
    %8 = vector.broadcast %7 : vector<2x1x128xf32> to vector<2x4x128xf32>
    %9 = arith.select %6, %8, %0 : vector<2x4x128xi1>, vector<2x4x128xf32>
    %c1_i32 = arith.constant 1 : i32
    %10 = vector.broadcast %c1_i32 : i32 to vector<2x4x1xi32>
    %11 = arith.cmpi eq, %1, %10 : vector<2x4x1xi32>
    %12 = vector.extract_strided_slice %0 {offsets = [0, 1, 0], sizes = [2, 1, 128], strides = [1, 1, 1]} : vector<2x4x128xf32> to vector<2x1x128xf32>
    %13 = vector.shape_cast %11 : vector<2x4x1xi1> to vector<2x4x1xi1>
    %14 = vector.broadcast %13 : vector<2x4x1xi1> to vector<2x4x128xi1>
    %15 = vector.shape_cast %12 : vector<2x1x128xf32> to vector<2x1x128xf32>
    %16 = vector.broadcast %15 : vector<2x1x128xf32> to vector<2x4x128xf32>
    %17 = arith.select %14, %16, %9 : vector<2x4x128xi1>, vector<2x4x128xf32>
    %c2_i32 = arith.constant 2 : i32
    %18 = vector.broadcast %c2_i32 : i32 to vector<2x4x1xi32>
    %19 = arith.cmpi eq, %1, %18 : vector<2x4x1xi32>
    %20 = vector.extract_strided_slice %0 {offsets = [0, 2, 0], sizes = [2, 1, 128], strides = [1, 1, 1]} : vector<2x4x128xf32> to vector<2x1x128xf32>
    %21 = vector.shape_cast %19 : vector<2x4x1xi1> to vector<2x4x1xi1>
    %22 = vector.broadcast %21 : vector<2x4x1xi1> to vector<2x4x128xi1>
    %23 = vector.shape_cast %20 : vector<2x1x128xf32> to vector<2x1x128xf32>
    %24 = vector.broadcast %23 : vector<2x1x128xf32> to vector<2x4x128xf32>
    %25 = arith.select %22, %24, %17 : vector<2x4x128xi1>, vector<2x4x128xf32>
    %c3_i32 = arith.constant 3 : i32
    %26 = vector.broadcast %c3_i32 : i32 to vector<2x4x1xi32>
    %27 = arith.cmpi eq, %1, %26 : vector<2x4x1xi32>
    %28 = vector.extract_strided_slice %0 {offsets = [0, 3, 0], sizes = [2, 1, 128], strides = [1, 1, 1]} : vector<2x4x128xf32> to vector<2x1x128xf32>
    %29 = vector.shape_cast %27 : vector<2x4x1xi1> to vector<2x4x1xi1>
    %30 = vector.broadcast %29 : vector<2x4x1xi1> to vector<2x4x128xi1>
    %31 = vector.shape_cast %28 : vector<2x1x128xf32> to vector<2x1x128xf32>
    %32 = vector.broadcast %31 : vector<2x1x128xf32> to vector<2x4x128xf32>
    %33 = arith.select %30, %32, %25 : vector<2x4x128xi1>, vector<2x4x128xf32>
    %c0_5 = arith.constant 0 : index
    %c0_6 = arith.constant 0 : index
    %c0_7 = arith.constant 0 : index
    %34 = vector.load %arg3[%c0_5, %c0_6, %c0_7] : memref<2x4x128xf32, #tpu.memory_space<vmem>>, vector<2x4x128xf32>
    tpu.vector_store %arg3[%c0_5, %c0_6, %c0_7], %33 {strides = array<i32>} : memref<2x4x128xf32, #tpu.memory_space<vmem>>, vector<2x4x128xf32>,
    return
  }
  func.func @transform_0(%arg0: i32) -> (i32, i32, i32) {
    %c0_i32 = arith.constant 0 : i32
    %c0_i32_0 = arith.constant 0 : i32
    %c0_i32_1 = arith.constant 0 : i32
    return %arg0, %c0_i32, %c0_i32_0 : i32, i32, i32
  }
  func.func @transform_1(%arg0: i32) -> (i32, i32, i32) {
    %c0_i32 = arith.constant 0 : i32
    %c0_i32_0 = arith.constant 0 : i32
    %c0_i32_1 = arith.constant 0 : i32
    return %arg0, %c0_i32, %c0_i32_0 : i32, i32, i32
  }
  func.func @transform_2(%arg0: i32) -> (i32, i32, i32) {
    %c0_i32 = arith.constant 0 : i32
    %c0_i32_0 = arith.constant 0 : i32
    %c0_i32_1 = arith.constant 0 : i32
    return %arg0, %c0_i32, %c0_i32_0 : i32, i32, i32
  }
}

</mosaic_0001>

<bundles_post_ra>
// kernel: _gather_channels_pallas.1
= control target key start
LH: loop header
LB: loop body
LE: loop exit
PB: predicated region body
PF: predicated region fallthrough
CT: control target
= control target key end

     0   :  { %s379_s9 = smov 0   ;;  %s404_s0 = inlined_call_operand.vmem [shape: s32[16,4,1], index: 0, kind: input, shape index: {}]   ;;  %s405_s1 = inlined_call_operand.vmem [shape: f32[16,4,128], index: 1, kind: input, shape index: {}, may-alias: {1,2}]   ;;  %s406_s2 = inlined_call_operand.vmem [shape: f32[16,4,128], index: 2, kind: output, shape index: {}, may-alias: {1,2}]  }
   0x1 LB: > { %s331_s10 = sadd.s32 4294967295, %s361_s9   ;;  %p335_p0 = scmp.ge.s32.totalorder %s361_s9, 1  ;;  %s361_s9 = sphi %s379_s9, %s12_s9  }
   0x2   : > { %p124_p1 = scmp.lt.s32.totalorder %s361_s9, 9 }
   0x4   : > { %p125_p2 = pnand %p335_p0, %p124_p1 }
   0x5   : > { %s336_s11 = sshll.u32 (!%p125_p2), %s331_s10, 1  ;;  %v363_v0 = vmov (!%p125_p2), 0   ;;  %v185_v11 = vlaneseq (!%p125_p2) }
   0x6   : > { %128 = sbr.rel (%p125_p2) target bundleno = 162 (0xa2), region = 28  ;;  %354 = vset.pattern.permute.xlu1 (!%p125_p2), %v363_v0  ;;  %353 = vset.pattern.permute.xlu0 (!%p125_p2), %v363_v0  ;;  %p152_p3 = scmp.lt.s32.totalorder (!%p125_p2), %s336_s11, 15 }
   0x7   : > { %v186_v12 = vshrl.u32 (!%p125_p2), %v185_v11, 7 }
   0x9   : > { %v187_v15 = vsub.s32 (!%p125_p2), 0, %v186_v12  ;;  %v209_v20 = vsub.s32 (!%p125_p2), 1, %v186_v12  ;;  %v231_v21 = vsub.s32 (!%p125_p2), 2, %v186_v12  ;;  %v253_v24 = vsub.s32 (!%p125_p2), 3, %v186_v12 }
   0xd   : > { %s408_s11 = smov (!%p152_p3, %s336_s11), 15 }
   0xe   : > { %s387_s12 = sshll.u32 %s408_s11, 2 }
   0xf   : > { %s155_s15 = scalar_lea.vmem %s404_s0, %s387_s12  ;;  %s161_s18 = scalar_lea.vmem %s405_s1, %s387_s12 }
  0x10   : > { %v171_v1 = vld [vmem:[%s155_s15] sm:$0xf]  ;;  %v172_v2 = vld [vmem:[%s155_s15 + $0x4] sm:$0xf]  ;;  %s167_s21 = scalar_lea.vmem %s406_s2, %s387_s12 }
  0x11   : > { %vm195_vm0 = vcmp.eq.s32.totalorder %v171_v1, 1  ;;  %vm173_vm1 = vcmp.eq.s32.totalorder %v171_v1, 0  ;;  %vm196_vm2 = vcmp.eq.s32.totalorder %v172_v2, 1  ;;  %vm174_vm3 = vcmp.eq.s32.totalorder %v172_v2, 0  ;;  %v169_v16 = vld [vmem:[%s161_s18] sm:$0xf] }
  0x12   : > { %v197_v3 = vsel %vm195_vm0, 1, %v363_v0  ;;  %v175_v4 = vsel %vm173_vm1, 1, %v363_v0  ;;  %v198_v5 = vsel %vm196_vm2, 1, %v363_v0  ;;  %v176_v6 = vsel %vm174_vm3, 1, %v363_v0  ;;  %v170_v17 = vld [vmem:[%s161_s18 + $0x4] sm:$0xf] }
  0x13   : > { %200 = vperm.xlu1 %354, %v197_v3   ;;  %178 = vperm.xlu0 %353, %v175_v4   ;;  %vm218_vm4 = vcmp.eq.s32.totalorder %v172_v2, 2  ;;  %vm217_vm5 = vcmp.eq.s32.totalorder %v171_v1, 2  ;;  %vm240_vm6 = vcmp.eq.s32.totalorder %v172_v2, 3  ;;  %vm239_vm7 = vcmp.eq.s32.totalorder %v171_v1, 3 }
  0x14   : > { %v220_v7 = vsel %vm218_vm4, 1, %v363_v0  ;;  %v219_v8 = vsel %vm217_vm5, 1, %v363_v0  ;;  %v242_v9 = vsel %vm240_vm6, 1, %v363_v0  ;;  %v241_v10 = vsel %vm239_vm7, 1, %v363_v0 }
  0x15   : > { %v188_v22 = vrot.slane %v169_v16, %v187_v15  ;;  %v192_v23 = vrot.slane %v170_v17, %v187_v15  ;;  %v214_v25 = vrot.slane %v170_v17, %v209_v20  ;;  %v236_v26 = vrot.slane %v170_v17, %v231_v21 }
  0x16   : > { %v210_v28 = vrot.slane %v169_v16, %v209_v20  ;;  %v232_v29 = vrot.slane %v169_v16, %v231_v21  ;;  %v258_v33 = vrot.slane %v170_v17, %v253_v24  ;;  %v254_v34 = vrot.slane %v169_v16, %v253_v24 }
  0x17   : > { %203 = vperm.xlu1 %354, %v198_v5   ;;  %181 = vperm.xlu0 %353, %v176_v6  }
  0x1b   : > { %225 = vperm.xlu1 %354, %v220_v7   ;;  %222 = vperm.xlu0 %353, %v219_v8  }
  0x1f   : > { %247 = vperm.xlu1 %354, %v242_v9   ;;  %244 = vperm.xlu0 %353, %v241_v10  }
  0x92   : > { %v201_v13 = vpop.permute.xlu1 %200  ;;  %v179_v14 = vpop.permute.xlu0 %178 }
  0x93   : > { %vm183_vm8 = vcmp.eq.s32.totalorder %v179_v14, 1  ;;  %vm205_vm10 = vcmp.eq.s32.totalorder %v201_v13, 1 }
  0x94   : > { %v193_v31 = vsel %vm183_vm8, %v188_v22, %v169_v16 }
  0x95   : > { %v215_v36 = vsel %vm205_vm10, %v210_v28, %v193_v31 }
  0x96   : > { %v204_v18 = vpop.permute.xlu1 %203  ;;  %v182_v19 = vpop.permute.xlu0 %181 }
  0x97   : > { %vm184_vm9 = vcmp.eq.s32.totalorder %v182_v19, 1  ;;  %vm206_vm11 = vcmp.eq.s32.totalorder %v204_v18, 1 }
  0x98   : > { %v194_v32 = vsel %vm184_vm9, %v192_v23, %v170_v17 }
  0x99   : > { %v216_v35 = vsel %vm206_vm11, %v214_v25, %v194_v32 }
  0x9a   : > { %v226_v27 = vpop.permute.xlu1 %225  ;;  %v223_v30 = vpop.permute.xlu0 %222 }
  0x9b   : > { %vm228_vm12 = vcmp.eq.s32.totalorder %v226_v27, 1  ;;  %vm227_vm13 = vcmp.eq.s32.totalorder %v223_v30, 1 }
  0x9c   : > { %v238_v39 = vsel %vm228_vm12, %v236_v26, %v216_v35  ;;  %v237_v40 = vsel %vm227_vm13, %v232_v29, %v215_v36 }
  0x9e   : > { %v248_v37 = vpop.permute.xlu1 %247  ;;  %v245_v38 = vpop.permute.xlu0 %244 }
  0x9f   : > { %vm250_vm14 = vcmp.eq.s32.totalorder %v248_v37, 1  ;;  %vm249_vm15 = vcmp.eq.s32.totalorder %v245_v38, 1 }
  0xa0   : > { %v260_v41 = vsel %vm250_vm14, %v258_v33, %v238_v39  ;;  %v259_v42 = vsel %vm249_vm15, %v254_v34, %v237_v40 }
  0xa1   : > { %262 = vst [vmem:[%s167_s21 + $0x4] sm:$0xf] %v260_v41  ;;  %261 = vst [vmem:[%s167_s21] sm:$0xf] %v259_v42 }
  0xa2 PF: > { %s12_s9 = sadd.s32 1, %s361_s9  }
  0xa3   : > { %p9_p4 = scmp.ge.s32.totalorder %s12_s9, 10  }
  0xa5   :  { %11 = sbr.rel (!%p9_p4) target bundleno = 1 (0x1), region = 61 }

</bundles_post_ra>
